<compile_context>
chip_gen: v6e
topology: v6e:2x2x1
jax: 0.10.0
libtpu: 0.0.40
codegen_flags: <defaults>
</compile_context>

<pallas_src>
import jax
import jax.numpy as jnp
from jax.experimental import pallas as pl
from jax.experimental.pallas import tpu as pltpu


def _round_up(x, m):
    return ((x + m - 1) // m) * m


def _vmem_budget_bytes():
    # ~3/4 of physical VMEM: ~96 MiB on v5e/v6e (128 MiB), ~48 MiB on v7x (64 MiB).
    try:
        cap = int(pltpu.get_tpu_info().vmem_capacity_bytes)
    except Exception:  # query unavailable -> assume the smallest (v7x) part
        cap = 64 * 1024 * 1024
    return (cap * 3) // 4


def _pick_tile_m(tile_m, M, K, Cpad, Cout, budget):
    tm = min(tile_m, _round_up(M, 8))
    tm = _round_up(tm, 8)

    def need(t):  # rough per-step VMEM footprint (double-buffered DMAs + f32 temps)
        return (2 * t * K * 2            # patches tile, bf16, 2 buffers
                + 2 * K * Cpad * 2       # weights, bf16, 2 buffers
                + t * Cpad * 4           # f32 conv value
                + 2 * t * Cout * 4       # output tile, 2 buffers
                + 2 * 8 * Cpad * 4)      # stats tile, 2 buffers

    while tm > 8 and need(tm) > budget // 2:   # leave half for compiler temporaries
        tm = _round_up(tm // 2, 8)
    return tm


def _conv_stats_kernel(p_ref, w_ref, stats_ref):
    # p_ref: (tm, K) bf16 im2col tile; w_ref: (K, Cpad) bf16 (same block every step).
    conv = jnp.dot(p_ref[...], w_ref[...], preferred_element_type=jnp.float32)  # (tm, Cpad) f32
    s = jnp.sum(conv, axis=0, keepdims=True)            # (1, Cpad)
    ss = jnp.sum(conv * conv, axis=0, keepdims=True)    # (1, Cpad)
    pad = jnp.zeros((6, conv.shape[1]), jnp.float32)    # pad sublanes 2 -> 8 (unmasked store)
    stats_ref[...] = jnp.concatenate([s, ss, pad], axis=0)


def _conv_bn_relu_kernel(p_ref, w_ref, scale_ref, shift_ref, o_ref):
    # Recompute the conv tile (cheaper than round-tripping an f32 intermediate via HBM).
    conv = jnp.dot(p_ref[...], w_ref[...], preferred_element_type=jnp.float32)  # (tm, Cpad) f32
    y = jnp.maximum(conv * scale_ref[...] + shift_ref[...], 0.0)
    cout = o_ref.shape[-1]
    o_ref[...] = y[:, :cout].astype(o_ref.dtype)         # compact (tm, Cout) store


def conv_batchnorm_relu(x_nchw, w_oihw, bias, gamma, beta, *, stride, padding,
                        eps=1e-5, tile_m=1024):
    # Conv bias is a per-channel constant -> exactly cancelled by training-mode BN mean.
    del bias

    N, Cin, H, W = x_nchw.shape
    Cout, _, KH, KW = w_oihw.shape
    OH = (H + 2 * padding - KH) // stride + 1
    OW = (W + 2 * padding - KW) // stride + 1
    M = N * OH * OW
    K = KH * KW * Cin
    Cpad = _round_up(Cout, 128)                      # lane-dense channel axis for the matmul

    budget = _vmem_budget_bytes()
    tm = _pick_tile_m(tile_m, M, K, Cpad, Cout, budget)
    Mpad = _round_up(M, tm)
    n_tiles = Mpad // tm
    out_itemsize = jnp.dtype(x_nchw.dtype).itemsize

    # ---- wrapper-side layout glue (XLA): NCHW -> NHWC, zero pad, im2col, bf16 cast ----
    x = jnp.transpose(x_nchw, (0, 2, 3, 1))
    x = jnp.pad(x, ((0, 0), (padding, padding), (padding, padding), (0, 0)))
    taps = []
    for kh in range(KH):
        for kw in range(KW):
            taps.append(jax.lax.slice(
                x, (0, kh, kw, 0),
                (N, kh + (OH - 1) * stride + 1, kw + (OW - 1) * stride + 1, Cin),
                (1, stride, stride, 1)))
    patches = jnp.concatenate(taps, axis=-1).reshape(M, K)            # (M, KH*KW*Cin)
    patches = jnp.pad(patches, ((0, Mpad - M), (0, 0))).astype(jnp.bfloat16)

    w = jnp.transpose(w_oihw, (2, 3, 1, 0)).reshape(K, Cout)          # (KH*KW*Cin, Cout)
    w = jnp.pad(w, ((0, 0), (0, Cpad - Cout))).astype(jnp.bfloat16)

    cparams = pltpu.CompilerParams(
        dimension_semantics=("parallel",),           # tiles split across TCs on v7x
        vmem_limit_bytes=budget,                     # ~96 MiB v5e/v6e, ~48 MiB v7x
    )

    # ---- pass 1: tiled im2col matmul -> per-tile sum / sum-of-squares only ----
    stats = pl.pallas_call(
        _conv_stats_kernel,
        grid=(n_tiles,),
        in_specs=[
            pl.BlockSpec((tm, K), lambda i: (i, 0)),
            pl.BlockSpec((K, Cpad), lambda i: (0, 0)),
        ],
        out_specs=pl.BlockSpec((None, 8, Cpad), lambda i: (i, 0, 0)),
        out_shape=jax.ShapeDtypeStruct((n_tiles, 8, Cpad), jnp.float32),
        compiler_params=cparams,
        cost_estimate=pl.CostEstimate(
            flops=2 * Mpad * K * Cpad,
            transcendentals=0,
            bytes_accessed=Mpad * K * 2 + K * Cpad * 2 + n_tiles * 8 * Cpad * 4),
    )(patches, w)

    # ---- fold BN (biased batch stats) into per-channel scale/shift, f32, tiny ----
    ssum = jnp.sum(stats[:, 0, :], axis=0)
    ssq = jnp.sum(stats[:, 1, :], axis=0)
    mean = ssum / M                                  # true M: zero-padded rows contribute nothing
    var = jnp.maximum(ssq / M - mean * mean, 0.0)    # E[x^2]-E[x]^2 in f32 (see header note)
    inv = jax.lax.rsqrt(var + eps)
    gamma_p = jnp.pad(gamma.astype(jnp.float32), (0, Cpad - Cout))
    beta_p = jnp.pad(beta.astype(jnp.float32), (0, Cpad - Cout))
    scale = (gamma_p * inv).reshape(1, Cpad)
    shift = (beta_p - mean * gamma_p * inv).reshape(1, Cpad)

    # ---- pass 2: recompute conv tile, apply BN affine + ReLU, compact (tm, Cout) store ----
    out_flat = pl.pallas_call(
        _conv_bn_relu_kernel,
        grid=(n_tiles,),
        in_specs=[
            pl.BlockSpec((tm, K), lambda i: (i, 0)),
            pl.BlockSpec((K, Cpad), lambda i: (0, 0)),
            pl.BlockSpec((1, Cpad), lambda i: (0, 0)),
            pl.BlockSpec((1, Cpad), lambda i: (0, 0)),
        ],
        out_specs=pl.BlockSpec((tm, Cout), lambda i: (i, 0)),
        out_shape=jax.ShapeDtypeStruct((Mpad, Cout), x_nchw.dtype),
        compiler_params=cparams,
        cost_estimate=pl.CostEstimate(
            flops=2 * Mpad * K * Cpad + 3 * Mpad * Cpad,
            transcendentals=0,
            bytes_accessed=Mpad * K * 2 + K * Cpad * 2 + 2 * Cpad * 4
                           + Mpad * Cout * out_itemsize),
    )(patches, w, scale, shift)

    out = out_flat[:M].reshape(N, OH, OW, Cout)
    return jnp.transpose(out, (0, 3, 1, 2))          # back to NCHW (module semantics)


def _reference(x, w, b, gamma, beta, *, stride, padding, eps=1e-5, bf16_inputs=False):
    xc, wc = (x, w) if not bf16_inputs else (x.astype(jnp.bfloat16), w.astype(jnp.bfloat16))
    conv = jax.lax.conv_general_dilated(
        xc, wc, (stride, stride), [(padding, padding), (padding, padding)],
        dimension_numbers=("NCHW", "OIHW", "NCHW"),
        preferred_element_type=jnp.float32,
    ) + b.reshape(1, -1, 1, 1)
    mean = conv.mean(axis=(0, 2, 3), keepdims=True)
    var = ((conv - mean) ** 2).mean(axis=(0, 2, 3), keepdims=True)
    y = (conv - mean) * jax.lax.rsqrt(var + eps) * gamma.reshape(1, -1, 1, 1) \
        + beta.reshape(1, -1, 1, 1)
    return jnp.maximum(y, 0.0)


if __name__ == "__main__":
    # ConvBatchNormRelu(in_channels=4, out_channels=8, kernel_size=3, stride=1, padding=1, bias=True)
    N, Cin, H, W = 2, 4, 16, 16
    Cout, Ksz, stride, padding = 8, 3, 1, 1

    key = jax.random.PRNGKey(0)
    kx, kw, kb, kg, kbeta = jax.random.split(key, 5)

    x = jax.random.normal(kx, (N, Cin, H, W), jnp.float32)
    w = jax.random.normal(kw, (Cout, Cin, Ksz, Ksz), jnp.float32) * 0.1   # Conv2d.weight
    b = jax.random.normal(kb, (Cout,), jnp.float32) * 0.1                 # Conv2d.bias
    gamma = 1.0 + 0.1 * jax.random.normal(kg, (Cout,), jnp.float32)       # BatchNorm2d.weight
    beta = 0.1 * jax.random.normal(kbeta, (Cout,), jnp.float32)           # BatchNorm2d.bias

    out = conv_batchnorm_relu(x, w, b, gamma, beta, stride=stride, padding=padding)
    out = jax.block_until_ready(out)
    assert out.shape == (N, Cout, H, W)

    # Tight check vs a reference that matches the kernel's bf16 MXU feed (f32 accumulation).
    ref_q = _reference(x, w, b, gamma, beta, stride=stride, padding=padding, bf16_inputs=True)
    assert jnp.allclose(out, ref_q, atol=2e-3, rtol=2e-3), "mismatch vs bf16-fed reference"

    # Loose check vs the full-f32 module semantics (difference is only bf16 input quantization).
    ref_f = _reference(x, w, b, gamma, beta, stride=stride, padding=padding, bf16_inputs=False)
    assert jnp.allclose(out, ref_f, atol=3e-2, rtol=3e-2), "mismatch vs f32 reference"

    print("KERNEL_OK")
</pallas_src>

<mosaic_0001>
module attributes {stable_mosaic.version = 11 : i64} {
  func.func @_conv_stats_kernel(%arg0: i32, %arg1: memref<512x36xbf16, #tpu.memory_space<vmem>>, %arg2: memref<36x128xbf16, #tpu.memory_space<vmem>>, %arg3: memref<1x8x128xf32, #tpu.memory_space<vmem>>) attributes {dimension_semantics = [#tpu.dimension_semantics<parallel>], iteration_bounds = array<i64: 1>, scalar_prefetch = 0 : i64, scratch_operands = 0 : i64, tpu.core_type = #tpu.core_type<tc>, window_params = [{transform_indices = @transform_0, window_bounds = array<i64: 512, 36>}, {pipeline_mode = #tpu.pipeline_mode<synchronous>, transform_indices = @transform_1, window_bounds = array<i64: 36, 128>}, {transform_indices = @transform_2, window_bounds = array<i64: 1, 8, 128>}]} {
    %c0 = arith.constant 0 : index
    %c0_0 = arith.constant 0 : index
    %0 = vector.load %arg1[%c0, %c0_0] : memref<512x36xbf16, #tpu.memory_space<vmem>>, vector<512x36xbf16>
    %c0_1 = arith.constant 0 : index
    %c0_2 = arith.constant 0 : index
    %1 = vector.load %arg2[%c0_1, %c0_2] : memref<36x128xbf16, #tpu.memory_space<vmem>>, vector<36x128xbf16>
    %cst = arith.constant dense<0.000000e+00> : vector<512x128xf32>
    %2 = tpu.matmul %0, %1, %cst {dimension_numbers = #tpu.dot_dimension_numbers<[1], [0], [0], [1], [0, 0, 1, 1], [], []>} : vector<512x36xbf16>, vector<36x128xbf16>, vector<512x128xf32> -> vector<512x128xf32>
    %cst_3 = arith.constant dense<0.000000e+00> : vector<128xf32>
    %3 = vector.multi_reduction <add>, %2, %cst_3 [0] : vector<512x128xf32> to vector<128xf32>
    %4 = vector.shape_cast %3 : vector<128xf32> to vector<1x128xf32>
    %5 = arith.mulf %2, %2 : vector<512x128xf32>
    %cst_4 = arith.constant dense<0.000000e+00> : vector<128xf32>
    %6 = vector.multi_reduction <add>, %5, %cst_4 [0] : vector<512x128xf32> to vector<128xf32>
    %7 = vector.shape_cast %6 : vector<128xf32> to vector<1x128xf32>
    %cst_5 = arith.constant 0.000000e+00 : f32
    %8 = vector.broadcast %cst_5 : f32 to vector<6x128xf32>
    %9 = tpu.concatenate %4, %7, %8 in 0 : vector<1x128xf32>, vector<1x128xf32>, vector<6x128xf32> -> vector<8x128xf32>
    %c0_6 = arith.constant 0 : index
    %c0_7 = arith.constant 0 : index
    %c0_8 = arith.constant 0 : index
    %10 = vector.load %arg3[%c0_6, %c0_7, %c0_8] : memref<1x8x128xf32, #tpu.memory_space<vmem>>, vector<1x8x128xf32>
    %11 = vector.shape_cast %10 : vector<1x8x128xf32> to vector<8x128xf32>
    %12 = vector.shape_cast %9 : vector<8x128xf32> to vector<1x8x128xf32>
    tpu.vector_store %arg3[%c0_6, %c0_7, %c0_8], %12 {strides = array<i32>} : memref<1x8x128xf32, #tpu.memory_space<vmem>>, vector<1x8x128xf32>,
    return
  }
  func.func @transform_0(%arg0: i32) -> (i32, i32) {
    %c0_i32 = arith.constant 0 : i32
    %c0_i32_0 = arith.constant 0 : i32
    return %arg0, %c0_i32 : i32, i32
  }
  func.func @transform_1(%arg0: i32) -> (i32, i32) {
    %c0_i32 = arith.constant 0 : i32
    %c0_i32_0 = arith.constant 0 : i32
    %c0_i32_1 = arith.constant 0 : i32
    return %c0_i32, %c0_i32_0 : i32, i32
  }
  func.func @transform_2(%arg0: i32) -> (i32, i32, i32) {
    %c0_i32 = arith.constant 0 : i32
    %c0_i32_0 = arith.constant 0 : i32
    %c0_i32_1 = arith.constant 0 : i32
    return %arg0, %c0_i32, %c0_i32_0 : i32, i32, i32
  }
}

</mosaic_0001>

<bundles_post_ra>
// kernel: tpu_custom_call.1
= control target key start
LH: loop header
LB: loop body
LE: loop exit
PB: predicated region body
PF: predicated region fallthrough
CT: control target
= control target key end

     0   :  { %vm354_vm0 = vcmask 1041408   ;;  %vm257_vm1 = vcmask 293888   ;;  %s1345_s0 = inlined_call_operand.vmem [shape: bf16[512,36], index: 0, kind: input, shape index: {}]   ;;  %s1346_s1 = inlined_call_operand.vmem [shape: bf16[36,128], index: 1, kind: input, shape index: {}]   ;;  %s1347_s2 = inlined_call_operand.hbm [shape: f32[1,8,128], index: 2, kind: output, shape index: {}]  }
   0x1   :  { %v1048_v0 = vld [vmem:[%s1346_s1 + $0x10] ss:$0 sps:$4 sm:$0x33]   ;;  %v1049_v1 = vld [vmem:[%s1346_s1 + $0x8] sm:$0xff]   ;;  %v1051_v3 = vld [vmem:[%s1345_s0] sm:$0xff]  }
   0x2   :  { %1045 = vmatprep.subr.msk.bf16.mxu0 %vm354_vm0, %v1048_v0  ;;  %v356_v2 = vsel %vm354_vm0, %v1048_v0, 0  ;;  %1046 = vmatprep.subr.msk.bf16.mxu1 %vm354_vm0, %v1048_v0  ;;  %v1050_v4 = vld [vmem:[%s1346_s1] sm:$0xff]   ;;  %v1052_v5 = vld [vmem:[%s1345_s0 + $0x8] sm:$0xff]   ;;  %v1053_v6 = vld [vmem:[%s1345_s0 + $0x10] sm:$0xff]  }
   0x3   :  { %970 = vmatpush3.bf16.msra.mxu0 %v356_v2  ;;  %1042 = vmatpush3.bf16.msra.mxu1 %v356_v2  ;;  %v1054_v7 = vld [vmem:[%s1345_s0 + $0x18] sm:$0xff]   ;;  %v1055_v8 = vld [vmem:[%s1345_s0 + $0x20] sm:$0xff]   ;;  %v1068_v10 = vld [vmem:[%s1345_s0 + $0x88] sm:$0xff]  }
   0x4   :  { %971 = vmatprep.subr.bf16.mxu0 %v1049_v1  ;;  %1040 = vmatprep.subr.bf16.mxu1 %v1049_v1  ;;  %v1067_v9 = vld [vmem:[%s1345_s0 + $0x80] sm:$0xff]   ;;  %v1069_v11 = vld [vmem:[%s1345_s0 + $0x90] sm:$0xff]   ;;  %v1056_v12 = vld [vmem:[%s1345_s0 + $0x28] sm:$0xff]  }
   0x5   :  { %975 = vmatprep.mubr.msk.bf16.mxu0 %vm257_vm1, %v1051_v3  ;;  %1007 = vmatprep.mubr.msk.bf16.mxu1 %vm257_vm1, %v1067_v9  ;;  %v1057_v13 = vld [vmem:[%s1345_s0 + $0x30] sm:$0xff]   ;;  %v1070_v14 = vld [vmem:[%s1345_s0 + $0x98] sm:$0xff]   ;;  %v1071_v15 = vld [vmem:[%s1345_s0 + $0xa0] sm:$0xff]  }
   0x6   :  { %v1058_v16 = vld [vmem:[%s1345_s0 + $0x38] sm:$0xff]   ;;  %v1072_v17 = vld [vmem:[%s1345_s0 + $0xa8] sm:$0xff]   ;;  %v1059_v18 = vld [vmem:[%s1345_s0 + $0x40] sm:$0xff]  }
   0x7   :  { %972 = vmatpush3.bf16.msra.mxu0 %v1049_v1  ;;  %1043 = vmatpush3.bf16.msra.mxu1 %v1049_v1  ;;  %v1073_v19 = vld [vmem:[%s1345_s0 + $0xb0] sm:$0xff]  }
   0x8   :  { %973 = vmatprep.subr.bf16.mxu0 %v1050_v4  ;;  %1041 = vmatprep.subr.bf16.mxu1 %v1050_v4 }
   0xb   :  { %974 = vmatpush3.bf16.msra.mxu0 %v1050_v4  ;;  %1044 = vmatpush3.bf16.msra.mxu1 %v1050_v4 }
   0xe   :  { %976 = vmatmul.mubr.msk.bf16.vlgmr.msra.gmra.mxu0 %vm257_vm1, %v1052_v5  ;;  %1008 = vmatmul.mubr.msk.bf16.vlgmr.msra.gmra.mxu1 %vm257_vm1, %v1068_v10 }
   0xf   :  { %979 = vmatprep.mubr.msk.bf16.mxu0 %vm257_vm1, %v1053_v6  ;;  %1011 = vmatprep.mubr.msk.bf16.mxu1 %vm257_vm1, %v1069_v11 }
  0x16   :  { %980 = vmatmul.mubr.msk.bf16.gmra.mxu0 %vm257_vm1, %v1054_v7  ;;  %1012 = vmatmul.mubr.msk.bf16.gmra.mxu1 %vm257_vm1, %v1070_v14 }
  0x17   :  { %983 = vmatprep.mubr.msk.bf16.mxu0 %vm257_vm1, %v1055_v8  ;;  %1015 = vmatprep.mubr.msk.bf16.mxu1 %vm257_vm1, %v1071_v15 }
  0x1e   :  { %984 = vmatmul.mubr.msk.bf16.gmra.mxu0 %vm257_vm1, %v1056_v12 }
  0x1f   :  { %987 = vmatprep.mubr.msk.bf16.mxu0 %vm257_vm1, %v1057_v13 }
  0x20   :  { %7 = vsyncpa [#allocation3], 0  ;;  %1016 = vmatmul.mubr.msk.bf16.gmra.mxu1 %vm257_vm1, %v1072_v17  ;;  %v1060_v20 = vld [vmem:[%s1345_s0 + $0x48] sm:$0xff]   ;;  %v1074_v21 = vld [vmem:[%s1345_s0 + $0xb8] sm:$0xff]   ;;  %vm849_vm2 = vcmask 1040384  }
  0x21   :  { %1019 = vmatprep.mubr.msk.bf16.mxu1 %vm257_vm1, %v1073_v19  ;;  %v1061_v22 = vld [vmem:[%s1345_s0 + $0x50] sm:$0xff]   ;;  %v1075_v23 = vld [vmem:[%s1345_s0 + $0xc0] sm:$0xff]   ;;  %v1062_v24 = vld [vmem:[%s1345_s0 + $0x58] sm:$0xff]  }
  0x22   :  { %v1076_v25 = vld [vmem:[%s1345_s0 + $0xc8] sm:$0xff]   ;;  %v1063_v26 = vld [vmem:[%s1345_s0 + $0x60] sm:$0xff]   ;;  %v1077_v27 = vld [vmem:[%s1345_s0 + $0xd0] sm:$0xff]  }
  0x23   :  { %v1064_v28 = vld [vmem:[%s1345_s0 + $0x68] sm:$0xff]   ;;  %v1078_v29 = vld [vmem:[%s1345_s0 + $0xd8] sm:$0xff]   ;;  %v1065_v30 = vld [vmem:[%s1345_s0 + $0x70] sm:$0xff]  }
  0x24   :  { %v1079_v31 = vld [vmem:[%s1345_s0 + $0xe0] sm:$0xff]   ;;  %v1066_v32 = vld [vmem:[%s1345_s0 + $0x78] sm:$0xff]   ;;  %v1080_v33 = vld [vmem:[%s1345_s0 + $0xe8] sm:$0xff]  }
  0x25   :  { %v1081_v34 = vld [vmem:[%s1345_s0 + $0xf0] sm:$0xff]   ;;  %v1082_v35 = vld [vmem:[%s1345_s0 + $0xf8] sm:$0xff]   ;;  %s1105_s0 = smov [#allocation2]  }
  0x26   :  { %988 = vmatmul.mubr.msk.bf16.gmra.mxu0 %vm257_vm1, %v1058_v16  ;;  %s859_s1 = sshll.u32 %s1105_s0, 4  ;;  %s860_s1 = int_to_ptr.vmem [resolvable:$true] %s859_s1 }
  0x27   :  { %991 = vmatprep.mubr.msk.bf16.mxu0 %vm257_vm1, %v1059_v18  ;;  %s1083_s21 = scalar_lea.vmem %s860_s1, 128  ;;  %p1088_p1 = scmp.lt.s32.totalorder %s860_s1, %s860_s1 }
  0x28   :  { %1020 = vmatmul.mubr.msk.bf16.gmra.mxu1 %vm257_vm1, %v1074_v21  ;;  %p1084_p0 = scmp.ne.s32.totalorder %s860_s1, %s1083_s21  ;;  %p1089_p2 = scmp.lt.s32.totalorder %s1083_s21, %s1083_s21 }
  0x29   :  { %1023 = vmatprep.mubr.msk.bf16.mxu1 %vm257_vm1, %v1075_v23 }
  0x2a   :  { %p1090_p3 = por %p1089_p2, %p1088_p1 }
  0x2c   :  { %p1091_p4 = pnand %p1090_p3, %p1084_p0 }
  0x2e   :  { %992 = vmatmul.mubr.msk.bf16.gmra.mxu0 %vm257_vm1, %v1060_v20 }
  0x2f   :  { %995 = vmatprep.mubr.msk.bf16.mxu0 %vm257_vm1, %v1061_v22 }
  0x30   :  { %1024 = vmatmul.mubr.msk.bf16.gmra.mxu1 %vm257_vm1, %v1076_v25 }
  0x31   :  { %1027 = vmatprep.mubr.msk.bf16.mxu1 %vm257_vm1, %v1077_v27 }
  0x36   :  { %996 = vmatmul.mubr.msk.bf16.gmra.mxu0 %vm257_vm1, %v1062_v24 }
  0x37   :  { %999 = vmatprep.mubr.msk.bf16.mxu0 %vm257_vm1, %v1063_v26 }
  0x38   :  { %1028 = vmatmul.mubr.msk.bf16.gmra.mxu1 %vm257_vm1, %v1078_v29 }
  0x39   :  { %1031 = vmatprep.mubr.msk.bf16.mxu1 %vm257_vm1, %v1079_v31 }
  0x3e   :  { %1000 = vmatmul.mubr.msk.bf16.gmra.mxu0 %vm257_vm1, %v1064_v28 }
  0x3f   :  { %1003 = vmatprep.mubr.msk.bf16.mxu0 %vm257_vm1, %v1065_v30 }
  0x40   :  { %1032 = vmatmul.mubr.msk.bf16.gmra.mxu1 %vm257_vm1, %v1080_v33 }
  0x41   :  { %1035 = vmatprep.mubr.msk.bf16.mxu1 %vm257_vm1, %v1081_v34 }
  0x46   :  { %1004 = vmatmul.mubr.msk.bf16.gmra.mxu0 %vm257_vm1, %v1066_v32 }
  0x48   :  { %1036 = vmatmul.mubr.msk.bf16.gmra.mxu1 %vm257_vm1, %v1082_v35 }
  0xce   :  { %v977_v36 = vpop.f32.mrf.mxu0  ;;  %v1261_v44 = vpop.f32.mrf.mxu1 }
  0xcf   :  { %v718_v45 = vmul.f32 %v977_v36, %v977_v36 }
  0xd0   :  { %v392_v37 = vpop.f32.mrf.mxu0  ;;  %v1263_v49 = vpop.f32.mrf.mxu1 }
  0xd1   :  { %v716_v40 = vmul.f32 %v392_v37, %v392_v37 }
  0xd2   :  { %v978_v38 = vpop.f32.mrf.mxu0  ;;  %v1265_v54 = vpop.f32.mrf.mxu1 }
  0xd3   :  { %v719_v50 = vmul.f32 %v978_v38, %v978_v38 }
  0xd4   :  { %v395_v39 = vpop.f32.mrf.mxu0  ;;  %v1267_v59 = vpop.f32.mrf.mxu1 }
  0xd5   :  { %v647_v41 = vadd.f32 %v395_v39, %v392_v37  ;;  %v717_v42 = vmul.f32 %v395_v39, %v395_v39 }
  0xd6   :  { %v981_v43 = vpop.f32.mrf.mxu0  ;;  %v1269_v0 = vpop.f32.mrf.mxu1 }
  0xd7   :  { %v648_v46 = vadd.f32 %v977_v36, %v647_v41  ;;  %v780_v47 = vadd.f32 %v717_v42, %v716_v40  ;;  %v722_v1 = vmul.f32 %v981_v43, %v981_v43 }
  0xd8   :  { %v408_v48 = vpop.f32.mrf.mxu0  ;;  %v1271_v9 = vpop.f32.mrf.mxu1 }
  0xd9   :  { %v781_v51 = vadd.f32 %v780_v47, %v718_v45  ;;  %v649_v52 = vadd.f32 %v978_v38, %v648_v46  ;;  %v720_v56 = vmul.f32 %v408_v48, %v408_v48 }
  0xda   :  { %v982_v53 = vpop.f32.mrf.mxu0  ;;  %v1273_v18 = vpop.f32.mrf.mxu1 }
  0xdb   :  { %v650_v55 = vadd.f32 %v649_v52, %v408_v48  ;;  %v782_v57 = vadd.f32 %v781_v51, %v719_v50  ;;  %v723_v5 = vmul.f32 %v982_v53, %v982_v53 }
  0xdc   :  { %v411_v58 = vpop.f32.mrf.mxu0  ;;  %v1275_v27 = vpop.f32.mrf.mxu1 }
  0xdd   :  { %v783_v60 = vadd.f32 %v782_v57, %v720_v56  ;;  %v651_v61 = vadd.f32 %v650_v55, %v411_v58  ;;  %v721_v62 = vmul.f32 %v411_v58, %v411_v58 }
  0xde   :  { %v985_v63 = vpop.f32.mrf.mxu0 }
  0xdf   :  { %v652_v2 = vadd.f32 %v981_v43, %v651_v61  ;;  %v784_v3 = vadd.f32 %v783_v60, %v721_v62  ;;  %v726_v19 = vmul.f32 %v985_v63, %v985_v63 }
  0xe0   :  { %v424_v4 = vpop.f32.mrf.mxu0  ;;  %v1277_v36 = vpop.f32.mrf.mxu1 }
  0xe1   :  { %v785_v6 = vadd.f32 %v784_v3, %v722_v1  ;;  %v653_v7 = vadd.f32 %v982_v53, %v652_v2  ;;  %v724_v11 = vmul.f32 %v424_v4, %v424_v4 }
  0xe2   :  { %v986_v8 = vpop.f32.mrf.mxu0  ;;  %v1279_v46 = vpop.f32.mrf.mxu1 }
  0xe3   :  { %v654_v10 = vadd.f32 %v653_v7, %v424_v4  ;;  %v786_v12 = vadd.f32 %v785_v6, %v723_v5  ;;  %v727_v23 = vmul.f32 %v986_v8, %v986_v8 }
  0xe4   :  { %v427_v13 = vpop.f32.mrf.mxu0  ;;  %v1281_v57 = vpop.f32.mrf.mxu1 }
  0xe5   :  { %v787_v14 = vadd.f32 %v786_v12, %v724_v11  ;;  %v655_v15 = vadd.f32 %v654_v10, %v427_v13  ;;  %v725_v16 = vmul.f32 %v427_v13, %v427_v13 }
  0xe6   :  { %v989_v17 = vpop.f32.mrf.mxu0  ;;  %v1283_v4 = vpop.f32.mrf.mxu1 }
  0xe7   :  { %v656_v20 = vadd.f32 %v985_v63, %v655_v15  ;;  %v788_v21 = vadd.f32 %v787_v14, %v725_v16  ;;  %v730_v37 = vmul.f32 %v989_v17, %v989_v17 }
  0xe8   :  { %v440_v22 = vpop.f32.mrf.mxu0  ;;  %v1285_v14 = vpop.f32.mrf.mxu1 }
  0xe9   :  { %v789_v24 = vadd.f32 %v788_v21, %v726_v19  ;;  %v657_v25 = vadd.f32 %v986_v8, %v656_v20  ;;  %v728_v29 = vmul.f32 %v440_v22, %v440_v22 }
  0xea   :  { %v990_v26 = vpop.f32.mrf.mxu0 }
  0xeb   :  { %v658_v28 = vadd.f32 %v657_v25, %v440_v22  ;;  %v790_v30 = vadd.f32 %v789_v24, %v727_v23  ;;  %v731_v41 = vmul.f32 %v990_v26, %v990_v26  ;;  %v1287_v24 = vpop.f32.mrf.mxu1 }
  0xec   :  { %v443_v31 = vpop.f32.mrf.mxu0 }
  0xed   :  { %v791_v32 = vadd.f32 %v790_v30, %v728_v29  ;;  %v659_v33 = vadd.f32 %v658_v28, %v443_v31  ;;  %v729_v34 = vmul.f32 %v443_v31, %v443_v31 }
  0xee   :  { %v993_v35 = vpop.f32.mrf.mxu0 }
  0xef   :  { %v660_v38 = vadd.f32 %v989_v17, %v659_v33  ;;  %v792_v39 = vadd.f32 %v791_v32, %v729_v34  ;;  %v734_v58 = vmul.f32 %v993_v35, %v993_v35  ;;  %v1289_v34 = vpop.f32.mrf.mxu1 }
  0xf0   :  { %v456_v40 = vpop.f32.mrf.mxu0 }
  0xf1   :  { %v793_v42 = vadd.f32 %v792_v39, %v730_v37  ;;  %v661_v43 = vadd.f32 %v990_v26, %v660_v38  ;;  %v732_v48 = vmul.f32 %v456_v40, %v456_v40 }
  0xf2   :  { %v994_v45 = vpop.f32.mrf.mxu0 }
  0xf3   :  { %v662_v47 = vadd.f32 %v661_v43, %v456_v40  ;;  %v794_v50 = vadd.f32 %v793_v42, %v731_v41  ;;  %v735_v63 = vmul.f32 %v994_v45, %v994_v45 }
  0xf4   :  { %v459_v51 = vpop.f32.mrf.mxu0 }
  0xf5   :  { %v795_v52 = vadd.f32 %v794_v50, %v732_v48  ;;  %v663_v53 = vadd.f32 %v662_v47, %v459_v51  ;;  %v733_v55 = vmul.f32 %v459_v51, %v459_v51 }
  0xf6   :  { %v997_v56 = vpop.f32.mrf.mxu0 }
  0xf7   :  { %v664_v60 = vadd.f32 %v993_v35, %v663_v53  ;;  %v796_v61 = vadd.f32 %v795_v52, %v733_v55  ;;  %v738_v15 = vmul.f32 %v997_v56, %v997_v56 }
  0xf8   :  { %v472_v62 = vpop.f32.mrf.mxu0 }
  0xf9   :  { %v797_v1 = vadd.f32 %v796_v61, %v734_v58  ;;  %v665_v2 = vadd.f32 %v994_v45, %v664_v60  ;;  %v736_v6 = vmul.f32 %v472_v62, %v472_v62  ;;  %v571_v45 = vpop.f32.mrf.mxu1 }
  0xfa   :  { %v998_v3 = vpop.f32.mrf.mxu0 }
  0xfb   :  { %v666_v5 = vadd.f32 %v665_v2, %v472_v62  ;;  %v798_v7 = vadd.f32 %v797_v1, %v735_v63  ;;  %v739_v20 = vmul.f32 %v998_v3, %v998_v3 }
  0xfc   :  { %v475_v8 = vpop.f32.mrf.mxu0 }
  0xfd   :  { %v799_v10 = vadd.f32 %v798_v7, %v736_v6  ;;  %v667_v11 = vadd.f32 %v666_v5, %v475_v8  ;;  %v737_v12 = vmul.f32 %v475_v8, %v475_v8  ;;  %v749_v8 = vmul.f32 %v1267_v59, %v1267_v59 }
  0xfe   :  { %v1001_v13 = vpop.f32.mrf.mxu0 }
  0xff   :  { %v668_v16 = vadd.f32 %v997_v56, %v667_v11  ;;  %v800_v17 = vadd.f32 %v799_v10, %v737_v12  ;;  %v742_v35 = vmul.f32 %v1001_v13, %v1001_v13  ;;  %v1291_v56 = vpop.f32.mrf.mxu1  ;;  %v750_v12 = vmul.f32 %v1261_v44, %v1261_v44 }
 0x100   :  { %v488_v19 = vpop.f32.mrf.mxu0 }
 0x101   :  { %v801_v21 = vadd.f32 %v800_v17, %v738_v15  ;;  %v669_v22 = vadd.f32 %v998_v3, %v668_v16  ;;  %v740_v26 = vmul.f32 %v488_v19, %v488_v19  ;;  %v584_v2 = vpop.f32.mrf.mxu1  ;;  %v748_v3 = vmul.f32 %v1263_v49, %v1263_v49 }
 0x102   :  { %v1002_v23 = vpop.f32.mrf.mxu0  ;;  %v751_v16 = vmul.f32 %v1265_v54, %v1265_v54 }
 0x103   :  { %v670_v25 = vadd.f32 %v669_v22, %v488_v19  ;;  %v802_v28 = vadd.f32 %v801_v21, %v739_v20  ;;  %v743_v40 = vmul.f32 %v1002_v23, %v1002_v23  ;;  %v1026_v11 = vpop.f32.mrf.mxu1 }
 0x104   :  { %v491_v29 = vpop.f32.mrf.mxu0 }
 0x105   :  { %v803_v30 = vadd.f32 %v802_v28, %v740_v26  ;;  %v671_v31 = vadd.f32 %v670_v25, %v491_v29  ;;  %v741_v32 = vmul.f32 %v491_v29, %v491_v29  ;;  %v754_v26 = vmul.f32 %v1269_v0, %v1269_v0 }
 0x106   :  { %v1005_v33 = vpop.f32.mrf.mxu0  ;;  %v755_v29 = vmul.f32 %v1273_v18, %v1273_v18 }
 0x107   :  { %v672_v37 = vadd.f32 %v1001_v13, %v671_v31  ;;  %v804_v38 = vadd.f32 %v803_v30, %v741_v32  ;;  %v746_v58 = vmul.f32 %v1005_v33, %v1005_v33 }
 0x108   :  { %v504_v39 = vpop.f32.mrf.mxu0 }
 0x109   :  { %v805_v41 = vadd.f32 %v804_v38, %v742_v35  ;;  %v673_v42 = vadd.f32 %v1002_v23, %v672_v37  ;;  %v744_v48 = vmul.f32 %v504_v39, %v504_v39 }
 0x10a   :  { %v1006_v43 = vpop.f32.mrf.mxu0 }
 0x10b   :  { %v674_v47 = vadd.f32 %v673_v42, %v504_v39  ;;  %v806_v50 = vadd.f32 %v805_v41, %v743_v40  ;;  %v747_v62 = vmul.f32 %v1006_v43, %v1006_v43  ;;  %v758_v39 = vmul.f32 %v1277_v36, %v1277_v36 }
 0x10c   :  { %v507_v51 = vpop.f32.mrf.mxu0  ;;  %v759_v41 = vmul.f32 %v1281_v57, %v1281_v57 }
 0x10d   :  { %v807_v52 = vadd.f32 %v806_v50, %v744_v48  ;;  %v675_v53 = vadd.f32 %v674_v47, %v507_v51  ;;  %v745_v55 = vmul.f32 %v507_v51, %v507_v51  ;;  %v760_v48 = vmul.f32 %v1287_v24, %v1287_v24 }
 0x10f   :  { %v676_v60 = vadd.f32 %v1005_v33, %v675_v53  ;;  %v808_v61 = vadd.f32 %v807_v52, %v745_v55  ;;  %v756_v33 = vmul.f32 %v1279_v46, %v1279_v46  ;;  %v761_v52 = vmul.f32 %v571_v45, %v571_v45 }
 0x111   :  { %v677_v63 = vadd.f32 %v1006_v43, %v676_v60  ;;  %v809_v1 = vadd.f32 %v808_v61, %v746_v58 }
 0x113   :  { %v810_v5 = vadd.f32 %v809_v1, %v747_v62  ;;  %v678_v6 = vadd.f32 %v677_v63, %v1263_v49  ;;  %v587_v49 = vpop.f32.mrf.mxu1 }
 0x115   :  { %v679_v7 = vadd.f32 %v678_v6, %v1267_v59  ;;  %v811_v10 = vadd.f32 %v810_v5, %v748_v3  ;;  %v752_v59 = vmul.f32 %v1271_v9, %v1271_v9  ;;  %v1029_v25 = vpop.f32.mrf.mxu1 }
 0x117   :  { %v680_v13 = vadd.f32 %v1261_v44, %v679_v7  ;;  %v812_v15 = vadd.f32 %v811_v10, %v749_v8  ;;  %v753_v44 = vmul.f32 %v1275_v27, %v1275_v27  ;;  %v600_v31 = vpop.f32.mrf.mxu1  ;;  %v766_v7 = vmul.f32 %v1291_v56, %v1291_v56 }
 0x118   :  { %v767_v10 = vmul.f32 %v1026_v11, %v1026_v11 }
 0x119   :  { %v813_v17 = vadd.f32 %v812_v15, %v750_v12  ;;  %v681_v19 = vadd.f32 %v1265_v54, %v680_v13  ;;  %v1030_v38 = vpop.f32.mrf.mxu1 }
 0x11b   :  { %v682_v20 = vadd.f32 %v681_v19, %v1271_v9  ;;  %v814_v21 = vadd.f32 %v813_v17, %v751_v16  ;;  %v603_v43 = vpop.f32.mrf.mxu1 }
 0x11d   :  { %v815_v22 = vadd.f32 %v814_v21, %v752_v59  ;;  %v683_v23 = vadd.f32 %v682_v20, %v1275_v27  ;;  %v1033_v53 = vpop.f32.mrf.mxu1  ;;  %v769_v20 = vmul.f32 %v603_v43, %v603_v43  ;;  %v770_v21 = vmul.f32 %v1029_v25, %v1029_v25 }
 0x11f   :  { %v684_v28 = vadd.f32 %v1269_v0, %v683_v23  ;;  %v816_v54 = vadd.f32 %v815_v22, %v753_v44  ;;  %v757_v0 = vmul.f32 %v1283_v4, %v1283_v4  ;;  %v616_v62 = vpop.f32.mrf.mxu1  ;;  %v771_v23 = vmul.f32 %v1030_v38, %v1030_v38 }
 0x121   :  { %v817_v30 = vadd.f32 %v816_v54, %v754_v26  ;;  %v685_v9 = vadd.f32 %v1273_v18, %v684_v28  ;;  %v1034_v6 = vpop.f32.mrf.mxu1  ;;  %v772_v54 = vmul.f32 %v616_v62, %v616_v62 }
 0x123   :  { %v686_v32 = vadd.f32 %v685_v9, %v1279_v46  ;;  %v818_v27 = vadd.f32 %v817_v30, %v755_v29  ;;  %v619_v15 = vpop.f32.mrf.mxu1 }
 0x124   :  { %v773_v9 = vmul.f32 %v619_v15, %v619_v15 }
 0x125   :  { %v819_v35 = vadd.f32 %v818_v27, %v756_v33  ;;  %v687_v37 = vadd.f32 %v686_v32, %v1283_v4  ;;  %v1037_v59 = vpop.f32.mrf.mxu1 }
 0x127   :  { %v688_v40 = vadd.f32 %v1277_v36, %v687_v37  ;;  %v820_v18 = vadd.f32 %v819_v35, %v757_v0  ;;  %v762_v36 = vmul.f32 %v1285_v14, %v1285_v14  ;;  %v632_v28 = vpop.f32.mrf.mxu1  ;;  %v775_v35 = vmul.f32 %v1034_v6, %v1034_v6 }
 0x129   :  { %v821_v42 = vadd.f32 %v820_v18, %v758_v39  ;;  %v689_v46 = vadd.f32 %v1281_v57, %v688_v40  ;;  %v763_v57 = vmul.f32 %v1289_v34, %v1289_v34  ;;  %v1038_v32 = vpop.f32.mrf.mxu1  ;;  %v776_v40 = vmul.f32 %v632_v28, %v632_v28 }
 0x12b   :  { %v690_v47 = vadd.f32 %v689_v46, %v1287_v24  ;;  %v822_v4 = vadd.f32 %v821_v42, %v759_v41  ;;  %v764_v24 = vmul.f32 %v584_v2, %v584_v2  ;;  %v635_v39 = vpop.f32.mrf.mxu1  ;;  %v778_v46 = vmul.f32 %v1037_v59, %v1037_v59 }
 0x12c   :  { %v777_v42 = vmul.f32 %v635_v39, %v635_v39 }
 0x12d   :  { %v823_v50 = vadd.f32 %v822_v4, %v760_v48  ;;  %v691_v51 = vadd.f32 %v690_v47, %v571_v45  ;;  %v765_v45 = vmul.f32 %v587_v49, %v587_v49  ;;  %v779_v48 = vmul.f32 %v1038_v32, %v1038_v32 }
 0x12f   :  { %v692_v55 = vadd.f32 %v1285_v14, %v691_v51  ;;  %v824_v58 = vadd.f32 %v823_v50, %v761_v52 }
 0x131   :  { %v825_v60 = vadd.f32 %v824_v58, %v762_v36  ;;  %v693_v61 = vadd.f32 %v1289_v34, %v692_v55  ;;  %v768_v34 = vmul.f32 %v600_v31, %v600_v31 }
 0x133   :  { %v694_v63 = vadd.f32 %v693_v61, %v584_v2  ;;  %v826_v1 = vadd.f32 %v825_v60, %v763_v57 }
 0x135   :  { %v827_v3 = vadd.f32 %v826_v1, %v764_v24  ;;  %v695_v5 = vadd.f32 %v694_v63, %v587_v49 }
 0x137   :  { %v696_v14 = vadd.f32 %v1291_v56, %v695_v5  ;;  %v828_v8 = vadd.f32 %v827_v3, %v765_v45 }
 0x139   :  { %v829_v12 = vadd.f32 %v828_v8, %v766_v7  ;;  %v697_v13 = vadd.f32 %v1026_v11, %v696_v14 }
 0x13b   :  { %v698_v16 = vadd.f32 %v697_v13, %v600_v31  ;;  %v830_v17 = vadd.f32 %v829_v12, %v767_v10  ;;  %v774_v31 = vmul.f32 %v1033_v53, %v1033_v53 }
 0x13d   :  { %v831_v19 = vadd.f32 %v830_v17, %v768_v34  ;;  %v699_v2 = vadd.f32 %v698_v16, %v603_v43 }
 0x13f   :  { %v700_v49 = vadd.f32 %v1029_v25, %v699_v2  ;;  %v832_v22 = vadd.f32 %v831_v19, %v769_v20 }
 0x141   :  { %v833_v44 = vadd.f32 %v832_v22, %v770_v21  ;;  %v701_v26 = vadd.f32 %v1030_v38, %v700_v49 }
 0x143   :  { %v702_v56 = vadd.f32 %v701_v26, %v616_v62  ;;  %v834_v29 = vadd.f32 %v833_v44, %v771_v23 }
 0x145   :  { %v835_v30 = vadd.f32 %v834_v29, %v772_v54  ;;  %v703_v11 = vadd.f32 %v702_v56, %v619_v15 }
 0x147   :  { %v704_v33 = vadd.f32 %v1033_v53, %v703_v11  ;;  %v836_v27 = vadd.f32 %v835_v30, %v773_v9 }
 0x149   :  { %v837_v37 = vadd.f32 %v836_v27, %v774_v31  ;;  %v705_v0 = vadd.f32 %v1034_v6, %v704_v33 }
 0x14b   :  { %v706_v25 = vadd.f32 %v705_v0, %v632_v28  ;;  %v838_v18 = vadd.f32 %v837_v37, %v775_v35 }
 0x14d   :  { %v839_v41 = vadd.f32 %v838_v18, %v776_v40  ;;  %v707_v38 = vadd.f32 %v706_v25, %v635_v39 }
 0x14f   :  { %v708_v43 = vadd.f32 %v1037_v59, %v707_v38  ;;  %v840_v47 = vadd.f32 %v839_v41, %v777_v42 }
 0x151   :  { %v709_v4 = vadd.f32 %v1038_v32, %v708_v43  ;;  %v841_v50 = vadd.f32 %v840_v47, %v778_v46 }
 0x153   :  { %v710_v51 = vrot.slane %v709_v4, 4  ;;  %v842_v52 = vadd.f32 %v841_v50, %v779_v48 }
 0x155   :  { %v711_v53 = vadd.f32 %v710_v51, %v709_v4  ;;  %v843_v36 = vrot.slane %v842_v52, 4 }
 0x157   :  { %v712_v55 = vrot.slane %v711_v53, 2  ;;  %v844_v58 = vadd.f32 %v843_v36, %v842_v52 }
 0x159   :  { %v713_v57 = vadd.f32 %v712_v55, %v711_v53  ;;  %v845_v60 = vrot.slane %v844_v58, 2 }
 0x15b   :  { %v714_v61 = vrot.slane %v713_v57, 1  ;;  %v846_v62 = vadd.f32 %v845_v60, %v844_v58 }
 0x15d   :  { %v847_v63 = vrot.slane %v846_v62, 1  ;;  %v715_v24 = vadd.f32 %v714_v61, %v713_v57 }
 0x15f   :  { %v848_v1 = vadd.f32 %v847_v63, %v846_v62 }
 0x161   :  { %v850_v3 = vsel %vm849_vm2, %v715_v24, %v848_v1 }
 0x162   :  { %v851_v5 = vsel %vm354_vm0, %v850_v3, 0.0 }
 0x163   :  { %852 = vst [vmem:[#allocation2] sm:$0xff] %v851_v5 }
 0x164   :  { %1094 = shalt.err (!%p1091_p4)
}
 0x165   :  { %862 = dma.vmem_to_hbm [thread:$0]  %s860_s1, 128, %s1347_s2, [#allocation3]  }
 0x166   :  { %1103 = dma.done.wait [#allocation3], 128  }
 0x167   :  { %1104 = vsyncadd [#allocation3], 4294967168 }
 0x168   :  { %866 = vsyncpa [#allocation3], 1 }

</bundles_post_ra>
